<compile_context>
chip_gen: v7x
topology: tpu7x:2x2x1
jax: 0.10.0
libtpu: 0.0.40
codegen_flags: <defaults>
</compile_context>

<pallas_src>
import functools

import jax
import jax.numpy as jnp
from jax.experimental import pallas as pl
from jax.experimental.pallas import tpu as pltpu


def _linear_lane_dense_kernel(w_ref, b_ref, x_ref, o_ref, *, out_f, in_f):
    # w_ref: SMEM (out_f*in_f,) flat weights, b_ref: SMEM (out_f,) biases
    # x_ref: VMEM (in_f, bb)   -- batch lane-dense
    # o_ref: VMEM (out_f, bb)  -- batch lane-dense
    x = x_ref[...]  # (in_f, bb) f32
    rows = []
    for j in range(out_f):              # out_f == 2, static unroll
        acc = x[0:1, :] * w_ref[j * in_f + 0]
        for k in range(1, in_f):        # in_f == 3, static unroll -> VPU FMAs
            acc = acc + x[k:k + 1, :] * w_ref[j * in_f + k]
        rows.append(acc + b_ref[j])
    # single (out_f, bb) lane-dense store
    o_ref[...] = jnp.concatenate(rows, axis=0).astype(o_ref.dtype)


def dynamic_forward(xu, weight, bias, *, block_b=2048):
    """Pallas implementation of dynamic.forward: y = xu @ W^T + b (nn.Linear(3, 2))."""
    B, in_f = xu.shape
    out_f = weight.shape[0]

    # Lane-dense layout: put batch on the last (lane) axis.
    xt = xu.T  # (in_f, B)

    # Batch block on the lane axis: multiple of 128, capped by block_b.
    bb = int(min(block_b, pl.cdiv(B, 128) * 128))
    Bp = int(pl.cdiv(B, bb)) * bb
    if Bp != B:
        xt = jnp.pad(xt, ((0, 0), (0, Bp - B)))

    kernel = functools.partial(_linear_lane_dense_kernel, out_f=out_f, in_f=in_f)

    out_t = pl.pallas_call(
        kernel,
        out_shape=jax.ShapeDtypeStruct((out_f, Bp), jnp.float32),
        grid=(Bp // bb,),
        in_specs=[
            pl.BlockSpec(memory_space=pltpu.MemorySpace.SMEM),   # flat weights (6,)
            pl.BlockSpec(memory_space=pltpu.MemorySpace.SMEM),   # bias (2,)
            pl.BlockSpec((in_f, bb), lambda i: (0, i)),          # x: (3, bb) lane-dense
        ],
        out_specs=pl.BlockSpec((out_f, bb), lambda i: (0, i)),   # y: (2, bb) lane-dense
        compiler_params=pltpu.CompilerParams(
            dimension_semantics=("parallel",),                   # shard batch across TCs
        ),
    )(weight.reshape(-1).astype(jnp.float32), bias.astype(jnp.float32), xt)

    return out_t[:, :B].T  # back to (B, out_f), matches nn.Linear output layout


def make_params():
    # Matches the module __init__:
    #   weight.fill_(0); w[0,0]=1; w[0,1]=1; w[1,1]=1; w[1,2]=1
    weight = jnp.array([[1.0, 1.0, 0.0],
                        [0.0, 1.0, 1.0]], dtype=jnp.float32)
    # nn.Linear's bias is left at its random default in the module; use a
    # deterministic value here (synthetic kernel, no checkpoint to load).
    bias = jnp.array([0.1, -0.2], dtype=jnp.float32)
    return weight, bias


if __name__ == "__main__":
    key = jax.random.PRNGKey(0)
    B = 8                                # small batch of (x, u) state-action rows
    xu = jax.random.normal(key, (B, 3), dtype=jnp.float32)

    weight, bias = make_params()

    out = dynamic_forward(xu, weight, bias)
    out = jax.block_until_ready(out)

    # reference check in plain JAX
    ref = xu @ weight.T + bias
    assert out.shape == (B, 2)
    assert jnp.allclose(out, ref, atol=1e-6, rtol=1e-6)

    print("KERNEL_OK")
</pallas_src>

<mosaic_0001>
module attributes {stable_mosaic.version = 11 : i64} {
  func.func @_linear_lane_dense_kernel(%arg0: i32, %arg1: memref<6xf32, #tpu.memory_space<smem>>, %arg2: memref<2xf32, #tpu.memory_space<smem>>, %arg3: memref<3x128xf32, #tpu.memory_space<vmem>>, %arg4: memref<2x128xf32, #tpu.memory_space<vmem>>) attributes {dimension_semantics = [#tpu.dimension_semantics<parallel>], iteration_bounds = array<i64: 1>, scalar_prefetch = 0 : i64, scratch_operands = 0 : i64, tpu.core_type = #tpu.core_type<tc>, window_params = [{transform_indices = @transform_0, window_bounds = array<i64: 6>}, {transform_indices = @transform_1, window_bounds = array<i64: 2>}, {transform_indices = @transform_2, window_bounds = array<i64: 3, 128>}, {transform_indices = @transform_3, window_bounds = array<i64: 2, 128>}]} {
    %c0 = arith.constant 0 : index
    %c0_0 = arith.constant 0 : index
    %0 = vector.load %arg3[%c0, %c0_0] : memref<3x128xf32, #tpu.memory_space<vmem>>, vector<3x128xf32>
    %1 = vector.extract_strided_slice %0 {offsets = [0, 0], sizes = [1, 128], strides = [1, 1]} : vector<3x128xf32> to vector<1x128xf32>
    %c0_1 = arith.constant 0 : index
    %2 = memref.load %arg1[%c0_1] : memref<6xf32, #tpu.memory_space<smem>>
    %3 = vector.broadcast %2 : f32 to vector<1x128xf32>
    %4 = arith.mulf %1, %3 : vector<1x128xf32>
    %5 = vector.extract_strided_slice %0 {offsets = [1, 0], sizes = [1, 128], strides = [1, 1]} : vector<3x128xf32> to vector<1x128xf32>
    %c1 = arith.constant 1 : index
    %6 = memref.load %arg1[%c1] : memref<6xf32, #tpu.memory_space<smem>>
    %7 = vector.broadcast %6 : f32 to vector<1x128xf32>
    %8 = arith.mulf %5, %7 : vector<1x128xf32>
    %9 = arith.addf %4, %8 : vector<1x128xf32>
    %10 = vector.extract_strided_slice %0 {offsets = [2, 0], sizes = [1, 128], strides = [1, 1]} : vector<3x128xf32> to vector<1x128xf32>
    %c2 = arith.constant 2 : index
    %11 = memref.load %arg1[%c2] : memref<6xf32, #tpu.memory_space<smem>>
    %12 = vector.broadcast %11 : f32 to vector<1x128xf32>
    %13 = arith.mulf %10, %12 : vector<1x128xf32>
    %14 = arith.addf %9, %13 : vector<1x128xf32>
    %c0_2 = arith.constant 0 : index
    %15 = memref.load %arg2[%c0_2] : memref<2xf32, #tpu.memory_space<smem>>
    %16 = vector.broadcast %15 : f32 to vector<1x128xf32>
    %17 = arith.addf %14, %16 : vector<1x128xf32>
    %18 = vector.extract_strided_slice %0 {offsets = [0, 0], sizes = [1, 128], strides = [1, 1]} : vector<3x128xf32> to vector<1x128xf32>
    %c3 = arith.constant 3 : index
    %19 = memref.load %arg1[%c3] : memref<6xf32, #tpu.memory_space<smem>>
    %20 = vector.broadcast %19 : f32 to vector<1x128xf32>
    %21 = arith.mulf %18, %20 : vector<1x128xf32>
    %22 = vector.extract_strided_slice %0 {offsets = [1, 0], sizes = [1, 128], strides = [1, 1]} : vector<3x128xf32> to vector<1x128xf32>
    %c4 = arith.constant 4 : index
    %23 = memref.load %arg1[%c4] : memref<6xf32, #tpu.memory_space<smem>>
    %24 = vector.broadcast %23 : f32 to vector<1x128xf32>
    %25 = arith.mulf %22, %24 : vector<1x128xf32>
    %26 = arith.addf %21, %25 : vector<1x128xf32>
    %27 = vector.extract_strided_slice %0 {offsets = [2, 0], sizes = [1, 128], strides = [1, 1]} : vector<3x128xf32> to vector<1x128xf32>
    %c5 = arith.constant 5 : index
    %28 = memref.load %arg1[%c5] : memref<6xf32, #tpu.memory_space<smem>>
    %29 = vector.broadcast %28 : f32 to vector<1x128xf32>
    %30 = arith.mulf %27, %29 : vector<1x128xf32>
    %31 = arith.addf %26, %30 : vector<1x128xf32>
    %c1_3 = arith.constant 1 : index
    %32 = memref.load %arg2[%c1_3] : memref<2xf32, #tpu.memory_space<smem>>
    %33 = vector.broadcast %32 : f32 to vector<1x128xf32>
    %34 = arith.addf %31, %33 : vector<1x128xf32>
    %35 = tpu.concatenate %17, %34 in 0 : vector<1x128xf32>, vector<1x128xf32> -> vector<2x128xf32>
    %c0_4 = arith.constant 0 : index
    %c0_5 = arith.constant 0 : index
    %36 = vector.load %arg4[%c0_4, %c0_5] : memref<2x128xf32, #tpu.memory_space<vmem>>, vector<2x128xf32>
    tpu.vector_store %arg4[%c0_4, %c0_5], %35 {strides = array<i32>} : memref<2x128xf32, #tpu.memory_space<vmem>>, vector<2x128xf32>,
    return
  }
  func.func @transform_0(%arg0: i32) -> i32 {
    %c0_i32 = arith.constant 0 : i32
    %c0_i32_0 = arith.constant 0 : i32
    return %c0_i32 : i32
  }
  func.func @transform_1(%arg0: i32) -> i32 {
    %c0_i32 = arith.constant 0 : i32
    %c0_i32_0 = arith.constant 0 : i32
    return %c0_i32 : i32
  }
  func.func @transform_2(%arg0: i32) -> (i32, i32) {
    %c0_i32 = arith.constant 0 : i32
    %c0_i32_0 = arith.constant 0 : i32
    return %c0_i32, %arg0 : i32, i32
  }
  func.func @transform_3(%arg0: i32) -> (i32, i32) {
    %c0_i32 = arith.constant 0 : i32
    %c0_i32_0 = arith.constant 0 : i32
    return %c0_i32, %arg0 : i32, i32
  }
}

</mosaic_0001>

<bundles_post_ra>
// kernel: tpu_custom_call.1
= control target key start
LH: loop header
LB: loop body
LE: loop exit
PB: predicated region body
PF: predicated region fallthrough
CT: control target
= control target key end

     0   :  { %8 = vsyncpa [#allocation4], 0  ;;  %s213_s0 = inlined_call_operand.hbm [shape: f32[6], index: 0, kind: input, shape index: {}]   ;;  %s214_s1 = inlined_call_operand.vmem [shape: f32[2], index: 1, kind: input, shape index: {}]   ;;  %s215_s2 = inlined_call_operand.vmem [shape: f32[3,128], index: 2, kind: input, shape index: {}]   ;;  %s216_s3 = inlined_call_operand.hbm [shape: f32[2,128], index: 3, kind: output, shape index: {}]  }
   0x1   :  { %9 = vsyncpa [#allocation5], 0 }
   0x2   :  { %10 = vsyncpa [#allocation3], 0  ;;  %s25_s14 = sshll.u32 %s214_s1, 4  ;;  %s110_s17 = scalar_lea.hbm %s213_s0, 16  ;;  %s26_s14 = int_to_ptr.vmem [resolvable:$true] %s25_s14 }
   0x3   :  { %p111_p0 = scmp.ne.s32.totalorder %s213_s0, %s110_s17  ;;  %p114_p1 = scmp.lt.u32.totalorder %s110_s17, %s213_s0 }
   0x5   :  { %p116_p2 = pnand %p114_p1, %p111_p0 }
   0x7   :  { %119 = shalt.err (!%p116_p2)
}
   0x8   :  { %s160_s22 = smov [#allocation2]   ;;  %s120_s1 = scalar_lea.vmem %s26_s14, 16 }
   0x9   :  { %18 = dma.hbm_to_smem %s213_s0, 16, %s160_s22, [#allocation4]  }
   0xa   :  { %p121_p3 = scmp.ne.s32.totalorder %s26_s14, %s120_s1  ;;  %p125_p4 = scmp.lt.s32.totalorder %s26_s14, %s26_s14 }
   0xb   :  { %p126_p5 = scmp.lt.s32.totalorder %s120_s1, %s120_s1 }
   0xd   :  { %p127_p6 = por %p126_p5, %p125_p4 }
   0xf   :  { %p128_p7 = pnand %p127_p6, %p121_p3 }
  0x11   :  { %131 = shalt.err (!%p128_p7)
}
  0x12   :  { %s161_s25 = smov [#allocation6]  }
  0x13   :  { %28 = dma.vmem_to_smem %s26_s14, 16, %s161_s25, [#allocation5]  }
  0x14   :  { %154 = dma.done.wait [#allocation4], 16  }
  0x15   :  { %155 = vsyncadd [#allocation4], 4294967280 }
  0x16   :  { %156 = dma.done.wait [#allocation5], 16  }
  0x17   :  { %157 = vsyncadd [#allocation5], 4294967280 }
  0x18   :  { %37 = sfence }
  0x19   :  { %s39_s26 = sld [smem:[#allocation2]]  ;;  %s101_s27 = sld [smem:[#allocation2 + $0x1]]  ;;  %v38_v0 = vld [vmem:[%s215_s2] sm:$0x7]  ;;  %vm82_vm0 = vcmask 1040384  }
  0x1a   :  { %s102_s28 = sld [smem:[#allocation2 + $0x2]]  ;;  %s103_s29 = sld [smem:[#allocation2 + $0x3]] }
  0x1b   :  { %s104_s0 = sld [smem:[#allocation2 + $0x4]]  ;;  %s105_s30 = sld [smem:[#allocation2 + $0x5]] }
  0x1c   :  { %s56_s6 = sld [smem:[#allocation6]]  ;;  %s106_s7 = sld [smem:[#allocation6 + $0x1]] }
  0x1d   :  { %s162_s2 = smov [#allocation7]  }
  0x1e   :  { %s91_s8 = sshll.u32 %s162_s2, 4  ;;  %s92_s8 = int_to_ptr.vmem [resolvable:$true] %s91_s8 }
  0x1f   :  { %v40_v1 = vstv %s39_s26  ;;  %v43_v2 = vstv %s101_s27  ;;  %s132_s9 = scalar_lea.vmem %s92_s8, 32  ;;  %p137_p9 = scmp.lt.s32.totalorder %s92_s8, %s92_s8 }
  0x20   :  { %v41_v3 = vmul.f32 %v40_v1, %v38_v0  ;;  %v44_v4 = vmul.f32 %v43_v2, %v38_v0  ;;  %v50_v5 = vstv %s102_s28  ;;  %v60_v7 = vstv %s103_s29  ;;  %p133_p8 = scmp.ne.s32.totalorder %s92_s8, %s132_s9  ;;  %p138_p10 = scmp.lt.s32.totalorder %s132_s9, %s132_s9 }
  0x21   :  { %v51_v6 = vmul.f32 %v50_v5, %v38_v0  ;;  %v63_v8 = vstv %s104_s0  ;;  %v61_v10 = vmul.f32 %v60_v7, %v38_v0  ;;  %v70_v12 = vstv %s105_s30 }
  0x22   :  { %v46_v9 = vrot.slane %v44_v4, 1  ;;  %v64_v11 = vmul.f32 %v63_v8, %v38_v0  ;;  %v71_v14 = vmul.f32 %v70_v12, %v38_v0  ;;  %v57_v20 = vstv %s56_s6  ;;  %p139_p11 = por %p138_p10, %p137_p9 }
  0x23   :  { %v53_v13 = vrot.slane %v51_v6, 2  ;;  %v77_v21 = vstv %s106_s7 }
  0x24   :  { %v48_v15 = vadd.f32 %v46_v9, %v41_v3  ;;  %v66_v16 = vrot.slane %v64_v11, 1  ;;  %v73_v17 = vrot.slane %v71_v14, 2  ;;  %p140_p12 = pnand %p139_p11, %p133_p8 }
  0x26   :  { %v55_v18 = vadd.f32 %v53_v13, %v48_v15  ;;  %v68_v19 = vadd.f32 %v66_v16, %v61_v10 }
  0x28   :  { %v75_v22 = vadd.f32 %v73_v17, %v68_v19  ;;  %v58_v23 = vadd.f32 %v57_v20, %v55_v18 }
  0x2a   :  { %v78_v24 = vadd.f32 %v77_v21, %v75_v22 }
  0x2c   :  { %v80_v25 = vrot.slane %v78_v24, 7 }
  0x2e   :  { %v83_v26 = vsel %vm82_vm0, %v58_v23, %v80_v25 }
  0x2f   :  { %84 = vst [vmem:[#allocation7] sm:$0x3] %v83_v26 }
  0x30   :  { %143 = shalt.err (!%p140_p12)
}
  0x31   :  { %s144_s12 = scalar_lea.hbm %s216_s3, 32 }
  0x32   :  { %p145_p13 = scmp.ne.s32.totalorder %s216_s3, %s144_s12  ;;  %p148_p0 = scmp.lt.u32.totalorder %s144_s12, %s216_s3 }
  0x34   :  { %p150_p1 = pnand %p148_p0, %p145_p13 }
  0x36   :  { %153 = shalt.err (!%p150_p1)
}
  0x37   :  { %94 = dma.vmem_to_hbm [thread:$0]  %s92_s8, 32, %s216_s3, [#allocation3]  }
  0x38   :  { %158 = dma.done.wait [#allocation3], 32  }
  0x39   :  { %159 = vsyncadd [#allocation3], 4294967264 }
  0x3a   :  { %98 = vsyncpa [#allocation3], 1 }
  0x3b   :  { %99 = vsyncpa [#allocation4], 1 }
  0x3c   :  { %100 = vsyncpa [#allocation5], 1 }

</bundles_post_ra>
